<compile_context>
chip_gen: v6e
topology: v6e:2x2x1
jax: 0.10.0
libtpu: 0.0.40
codegen_flags: <defaults>
</compile_context>

<pallas_src>
import jax
import jax.numpy as jnp
from jax.experimental import pallas as pl
from jax.experimental.pallas import tpu as pltpu


def _round_up(x, m):
    return (x + m - 1) // m * m


def discriminator_kernel(x_ref, w1_ref, b1_ref, w2_ref, b2_ref, w3_ref, b3_ref, o_ref):
    # x_ref: (TB, D) f32 | w1: (D, H) bf16 | w2: (H, H) bf16 | w3: (1, H) bf16
    # b1/b2: (1, H) f32  | b3: (1, 1) f32  | o_ref: (1, 1, TB) f32 (lane-dense)
    x = x_ref[...].astype(jnp.bfloat16)   # cast after the DMA: x crosses HBM once as f32

    # linear1 + leaky_relu(0.2): bf16 MXU operands, f32 accumulation & activation.
    h1 = jnp.dot(x, w1_ref[...], preferred_element_type=jnp.float32) + b1_ref[...]
    h1 = jnp.where(h1 > 0, h1, 0.2 * h1)

    # linear2 + leaky_relu(0.2)
    h2 = jnp.dot(h1.astype(jnp.bfloat16), w2_ref[...],
                 preferred_element_type=jnp.float32) + b2_ref[...]
    h2 = jnp.where(h2 > 0, h2, 0.2 * h2)

    # linear3 (out_features = 1): (1,H) x (TB,H) contraction over H -> (1, TB) on the
    # (otherwise idle) MXU, so the output writeback is a dense row of TB lanes instead
    # of a masked (TB, 1) column store.
    logits = jax.lax.dot_general(
        w3_ref[...], h2.astype(jnp.bfloat16),
        dimension_numbers=(((1,), (1,)), ((), ())),
        preferred_element_type=jnp.float32) + b3_ref[...]            # (1, TB)

    # sigmoid on the EUP slot: exp + exact reciprocal.
    sig = pl.reciprocal(1.0 + jnp.exp(-logits), approx=False)
    o_ref[...] = sig.reshape(o_ref.shape)


def discriminator_forward(x, params, *, block_b=1024):
    w1, b1, w2, b2, w3, b3 = params
    B, D = x.shape
    H = w1.shape[1]

    # bf16 weights (tiny, VMEM-resident); biases stay f32; x stays f32 (cast in-kernel).
    w1_bf = w1.astype(jnp.bfloat16)
    w2_bf = w2.astype(jnp.bfloat16)
    w3_bf = w3.reshape(1, H).astype(jnp.bfloat16)   # (1, H) row for the (1,H)x(H,TB) dot
    b1_f = b1.reshape(1, H).astype(jnp.float32)
    b2_f = b2.reshape(1, H).astype(jnp.float32)
    b3_f = b3.reshape(1, 1).astype(jnp.float32)

    # Batch tile: as big as block_b allows (amortizes per-step overhead / DMA), multiple
    # of 8 sublanes, and capped so the grid keeps >= 2 steps (v7x megacore) when B allows.
    tb = min(block_b, _round_up(max(pl.cdiv(B, 2), 8), 8))
    b_pad = _round_up(B, tb)
    x_in = x.astype(jnp.float32)
    if b_pad != B:
        # TODO(synk): replace the pad pass with a masked tail block for very large ragged B.
        x_in = jnp.pad(x_in, ((0, b_pad - B), (0, 0)))
    grid = b_pad // tb

    const = lambda shape: pl.BlockSpec(shape, lambda i: tuple(0 for _ in shape))

    flops = 2 * b_pad * (D * H + H * H + H)
    bytes_accessed = (
        x_in.size * 4                                   # f32 activations in
        + (w1_bf.size + w2_bf.size + w3_bf.size) * 2    # bf16 weights (resident)
        + (b1_f.size + b2_f.size + b3_f.size) * 4       # f32 biases
        + b_pad * 4                                      # f32 output
    )

    out = pl.pallas_call(
        discriminator_kernel,
        out_shape=jax.ShapeDtypeStruct((grid, 1, tb), jnp.float32),
        grid_spec=pltpu.PrefetchScalarGridSpec(
            num_scalar_prefetch=0,
            grid=(grid,),
            in_specs=[
                pl.BlockSpec((tb, D), lambda i: (i, 0)),   # x: batch-tiled, double-buffered
                const(w1_bf.shape), const(b1_f.shape),     # params: VMEM-resident
                const(w2_bf.shape), const(b2_f.shape),
                const(w3_bf.shape), const(b3_f.shape),
            ],
            # Lane-dense output: block (1, 1, TB); last dim = TB (multiple of 128 for
            # realistic batch tiles) -> unmasked vst, dense writeback DMA.
            out_specs=pl.BlockSpec((1, 1, tb), lambda i: (i, 0, 0)),
        ),
        compiler_params=pltpu.CompilerParams(
            dimension_semantics=("parallel",),             # megacore sharding on v7x
        ),
        cost_estimate=pl.CostEstimate(
            flops=flops, transcendentals=b_pad, bytes_accessed=bytes_accessed),
    )(x_in, w1_bf, b1_f, w2_bf, b2_f, w3_bf, b3_f)

    return out.reshape(b_pad, 1)[:B]


def init_params(key, in_features, hidden_size):
    # Deterministic synthetic init (PyTorch-style uniform bound 1/sqrt(fan_in)).
    ks = jax.random.split(key, 6)

    def lin(kw, kb, fan_in, fan_out):
        bound = 1.0 / jnp.sqrt(fan_in)
        w = jax.random.uniform(kw, (fan_in, fan_out), jnp.float32, -bound, bound)
        b = jax.random.uniform(kb, (1, fan_out), jnp.float32, -bound, bound)
        return w, b

    w1, b1 = lin(ks[0], ks[1], in_features, hidden_size)
    w2, b2 = lin(ks[2], ks[3], hidden_size, hidden_size)
    w3, b3 = lin(ks[4], ks[5], hidden_size, 1)
    return w1, b1, w2, b2, w3, b3


def reference_forward(x, params):
    # Pure-JAX reference using the same bf16-operand / f32-accumulation recipe
    # (including the bf16 cast of h2 feeding the final dot).
    w1, b1, w2, b2, w3, b3 = params
    h1 = jnp.dot(x.astype(jnp.bfloat16), w1.astype(jnp.bfloat16),
                 preferred_element_type=jnp.float32) + b1.reshape(1, -1)
    h1 = jnp.where(h1 > 0, h1, 0.2 * h1)
    h2 = jnp.dot(h1.astype(jnp.bfloat16), w2.astype(jnp.bfloat16),
                 preferred_element_type=jnp.float32) + b2.reshape(1, -1)
    h2 = jnp.where(h2 > 0, h2, 0.2 * h2)
    logits = jnp.dot(h2.astype(jnp.bfloat16),
                     w3.reshape(1, -1).astype(jnp.bfloat16).T,
                     preferred_element_type=jnp.float32) + b3.reshape(1, 1)
    return jax.nn.sigmoid(logits)


if __name__ == "__main__":
    # img_shape = (img_rows, img_cols, channels) = (16, 16, 1)  -> D = 256
    img_rows, img_cols, channels = 16, 16, 1
    in_features = img_rows * img_cols * channels
    hidden_size = 128
    batch = 512  # -> two 256-row tiles: exercises the pipelined grid + v7x megacore path

    key = jax.random.PRNGKey(0)
    kx, kp = jax.random.split(key)
    x = jax.random.normal(kx, (batch, in_features), jnp.float32)
    params = init_params(kp, in_features, hidden_size)

    out = discriminator_forward(x, params)
    out = jax.block_until_ready(out)

    ref = reference_forward(x, params)
    assert out.shape == (batch, 1), out.shape
    # Tolerance accounts for bf16 matmul operands.
    assert jnp.allclose(out, ref, atol=1e-2, rtol=1e-2), "mismatch vs. JAX reference"

    print("KERNEL_OK")
</pallas_src>

<mosaic_0001>
module attributes {stable_mosaic.version = 11 : i64} {
  func.func @discriminator_kernel(%arg0: i32, %arg1: memref<256x256xf32, #tpu.memory_space<vmem>>, %arg2: memref<256x128xbf16, #tpu.memory_space<vmem>>, %arg3: memref<1x128xf32, #tpu.memory_space<vmem>>, %arg4: memref<128x128xbf16, #tpu.memory_space<vmem>>, %arg5: memref<1x128xf32, #tpu.memory_space<vmem>>, %arg6: memref<1x128xbf16, #tpu.memory_space<vmem>>, %arg7: memref<1x1xf32, #tpu.memory_space<vmem>>, %arg8: memref<1x1x256xf32, #tpu.memory_space<vmem>>) attributes {dimension_semantics = [#tpu.dimension_semantics<parallel>], iteration_bounds = array<i64: 2>, scalar_prefetch = 0 : i64, scratch_operands = 0 : i64, tpu.core_type = #tpu.core_type<tc>, window_params = [{transform_indices = @transform_0, window_bounds = array<i64: 256, 256>}, {pipeline_mode = #tpu.pipeline_mode<synchronous>, transform_indices = @transform_1, window_bounds = array<i64: 256, 128>}, {pipeline_mode = #tpu.pipeline_mode<synchronous>, transform_indices = @transform_2, window_bounds = array<i64: 1, 128>}, {pipeline_mode = #tpu.pipeline_mode<synchronous>, transform_indices = @transform_3, window_bounds = array<i64: 128, 128>}, {pipeline_mode = #tpu.pipeline_mode<synchronous>, transform_indices = @transform_4, window_bounds = array<i64: 1, 128>}, {pipeline_mode = #tpu.pipeline_mode<synchronous>, transform_indices = @transform_5, window_bounds = array<i64: 1, 128>}, {pipeline_mode = #tpu.pipeline_mode<synchronous>, transform_indices = @transform_6, window_bounds = array<i64: 1, 1>}, {transform_indices = @transform_7, window_bounds = array<i64: 1, 1, 256>}]} {
    %c0 = arith.constant 0 : index
    %c0_0 = arith.constant 0 : index
    %0 = vector.load %arg1[%c0, %c0_0] : memref<256x256xf32, #tpu.memory_space<vmem>>, vector<256x256xf32>
    %1 = arith.truncf %0 : vector<256x256xf32> to vector<256x256xbf16>
    %c0_1 = arith.constant 0 : index
    %c0_2 = arith.constant 0 : index
    %2 = vector.load %arg2[%c0_1, %c0_2] : memref<256x128xbf16, #tpu.memory_space<vmem>>, vector<256x128xbf16>
    %cst = arith.constant dense<0.000000e+00> : vector<256x128xf32>
    %3 = tpu.matmul %1, %2, %cst {dimension_numbers = #tpu.dot_dimension_numbers<[1], [0], [0], [1], [0, 0, 1, 1], [], []>} : vector<256x256xbf16>, vector<256x128xbf16>, vector<256x128xf32> -> vector<256x128xf32>
    %c0_3 = arith.constant 0 : index
    %c0_4 = arith.constant 0 : index
    %4 = vector.load %arg3[%c0_3, %c0_4] : memref<1x128xf32, #tpu.memory_space<vmem>>, vector<1x128xf32>
    %5 = vector.broadcast %4 : vector<1x128xf32> to vector<256x128xf32>
    %6 = arith.addf %3, %5 : vector<256x128xf32>
    %cst_5 = arith.constant 0.000000e+00 : f32
    %7 = vector.broadcast %cst_5 : f32 to vector<256x128xf32>
    %8 = arith.cmpf ogt, %6, %7 : vector<256x128xf32>
    %cst_6 = arith.constant 2.000000e-01 : f32
    %9 = vector.broadcast %cst_6 : f32 to vector<256x128xf32>
    %10 = arith.mulf %9, %6 : vector<256x128xf32>
    %11 = arith.select %8, %6, %10 : vector<256x128xi1>, vector<256x128xf32>
    %12 = arith.truncf %11 : vector<256x128xf32> to vector<256x128xbf16>
    %c0_7 = arith.constant 0 : index
    %c0_8 = arith.constant 0 : index
    %13 = vector.load %arg4[%c0_7, %c0_8] : memref<128x128xbf16, #tpu.memory_space<vmem>>, vector<128x128xbf16>
    %cst_9 = arith.constant dense<0.000000e+00> : vector<256x128xf32>
    %14 = tpu.matmul %12, %13, %cst_9 {dimension_numbers = #tpu.dot_dimension_numbers<[1], [0], [0], [1], [0, 0, 1, 1], [], []>} : vector<256x128xbf16>, vector<128x128xbf16>, vector<256x128xf32> -> vector<256x128xf32>
    %c0_10 = arith.constant 0 : index
    %c0_11 = arith.constant 0 : index
    %15 = vector.load %arg5[%c0_10, %c0_11] : memref<1x128xf32, #tpu.memory_space<vmem>>, vector<1x128xf32>
    %16 = vector.broadcast %15 : vector<1x128xf32> to vector<256x128xf32>
    %17 = arith.addf %14, %16 : vector<256x128xf32>
    %cst_12 = arith.constant 0.000000e+00 : f32
    %18 = vector.broadcast %cst_12 : f32 to vector<256x128xf32>
    %19 = arith.cmpf ogt, %17, %18 : vector<256x128xf32>
    %cst_13 = arith.constant 2.000000e-01 : f32
    %20 = vector.broadcast %cst_13 : f32 to vector<256x128xf32>
    %21 = arith.mulf %20, %17 : vector<256x128xf32>
    %22 = arith.select %19, %17, %21 : vector<256x128xi1>, vector<256x128xf32>
    %c0_14 = arith.constant 0 : index
    %c0_15 = arith.constant 0 : index
    %23 = vector.load %arg6[%c0_14, %c0_15] : memref<1x128xbf16, #tpu.memory_space<vmem>>, vector<1x128xbf16>
    %24 = arith.truncf %22 : vector<256x128xf32> to vector<256x128xbf16>
    %cst_16 = arith.constant dense<0.000000e+00> : vector<1x256xf32>
    %25 = tpu.matmul %23, %24, %cst_16 {dimension_numbers = #tpu.dot_dimension_numbers<[1], [1], [0], [0], [0, 0, 1, 0], [], []>} : vector<1x128xbf16>, vector<256x128xbf16>, vector<1x256xf32> -> vector<1x256xf32>
    %c0_17 = arith.constant 0 : index
    %c0_18 = arith.constant 0 : index
    %26 = vector.load %arg7[%c0_17, %c0_18] : memref<1x1xf32, #tpu.memory_space<vmem>>, vector<1x1xf32>
    %27 = vector.broadcast %26 : vector<1x1xf32> to vector<1x256xf32>
    %28 = arith.addf %25, %27 : vector<1x256xf32>
    %cst_19 = arith.constant 0.000000e+00 : f32
    %29 = vector.broadcast %cst_19 : f32 to vector<1x256xf32>
    %30 = arith.subf %29, %28 : vector<1x256xf32>
    %31 = math.exp %30 : vector<1x256xf32>
    %cst_20 = arith.constant 1.000000e+00 : f32
    %32 = vector.broadcast %cst_20 : f32 to vector<1x256xf32>
    %33 = arith.addf %32, %31 : vector<1x256xf32>
    %34 = tpu.reciprocal %33 : vector<1x256xf32> -> vector<1x256xf32>
    %35 = vector.shape_cast %34 : vector<1x256xf32> to vector<1x1x256xf32>
    %c0_21 = arith.constant 0 : index
    %c0_22 = arith.constant 0 : index
    %c0_23 = arith.constant 0 : index
    %36 = vector.load %arg8[%c0_21, %c0_22, %c0_23] : memref<1x1x256xf32, #tpu.memory_space<vmem>>, vector<1x1x256xf32>
    tpu.vector_store %arg8[%c0_21, %c0_22, %c0_23], %35 {strides = array<i32>} : memref<1x1x256xf32, #tpu.memory_space<vmem>>, vector<1x1x256xf32>,
    return
  }
  func.func @transform_0(%arg0: i32) -> (i32, i32) {
    %c0_i32 = arith.constant 0 : i32
    %c0_i32_0 = arith.constant 0 : i32
    return %arg0, %c0_i32 : i32, i32
  }
  func.func @transform_1(%arg0: i32) -> (i32, i32) {
    %c0_i32 = arith.constant 0 : i32
    %c0_i32_0 = arith.constant 0 : i32
    %c0_i32_1 = arith.constant 0 : i32
    return %c0_i32, %c0_i32_0 : i32, i32
  }
  func.func @transform_2(%arg0: i32) -> (i32, i32) {
    %c0_i32 = arith.constant 0 : i32
    %c0_i32_0 = arith.constant 0 : i32
    %c0_i32_1 = arith.constant 0 : i32
    return %c0_i32, %c0_i32_0 : i32, i32
  }
  func.func @transform_3(%arg0: i32) -> (i32, i32) {
    %c0_i32 = arith.constant 0 : i32
    %c0_i32_0 = arith.constant 0 : i32
    %c0_i32_1 = arith.constant 0 : i32
    return %c0_i32, %c0_i32_0 : i32, i32
  }
  func.func @transform_4(%arg0: i32) -> (i32, i32) {
    %c0_i32 = arith.constant 0 : i32
    %c0_i32_0 = arith.constant 0 : i32
    %c0_i32_1 = arith.constant 0 : i32
    return %c0_i32, %c0_i32_0 : i32, i32
  }
  func.func @transform_5(%arg0: i32) -> (i32, i32) {
    %c0_i32 = arith.constant 0 : i32
    %c0_i32_0 = arith.constant 0 : i32
    %c0_i32_1 = arith.constant 0 : i32
    return %c0_i32, %c0_i32_0 : i32, i32
  }
  func.func @transform_6(%arg0: i32) -> (i32, i32) {
    %c0_i32 = arith.constant 0 : i32
    %c0_i32_0 = arith.constant 0 : i32
    %c0_i32_1 = arith.constant 0 : i32
    return %c0_i32, %c0_i32_0 : i32, i32
  }
  func.func @transform_7(%arg0: i32) -> (i32, i32, i32) {
    %c0_i32 = arith.constant 0 : i32
    %c0_i32_0 = arith.constant 0 : i32
    %c0_i32_1 = arith.constant 0 : i32
    return %arg0, %c0_i32, %c0_i32_0 : i32, i32, i32
  }
}

</mosaic_0001>

<bundles_post_ra>
// kernel: tpu_custom_call.1
= control target key start
LH: loop header
LB: loop body
LE: loop exit
PB: predicated region body
PF: predicated region fallthrough
CT: control target
= control target key end

     0   :  { %s2331_s0 = inlined_call_operand.hbm [shape: f32[512,256], index: 0, kind: input, shape index: {}]   ;;  %s2332_s1 = inlined_call_operand.hbm [shape: bf16[256,128], index: 1, kind: input, shape index: {}]   ;;  %s2333_s2 = inlined_call_operand.vmem [shape: f32[1,128], index: 2, kind: input, shape index: {}]   ;;  %s2334_s3 = inlined_call_operand.hbm [shape: bf16[128,128], index: 3, kind: input, shape index: {}]   ;;  %s2335_s4 = inlined_call_operand.vmem [shape: f32[1,128], index: 4, kind: input, shape index: {}]   ;;  %s2336_s5 = inlined_call_operand.vmem [shape: bf16[1,128], index: 5, kind: input, shape index: {}]   ;;  %s2337_s6 = inlined_call_operand.<no memory space> [shape: f32[1,1], index: 6, kind: input, shape index: {}]   ;;  %s2338_s7 = inlined_call_operand.hbm [shape: f32[2,1,256], index: 7, kind: output, shape index: {}]  }
   0x1   :  { %v12_v0 = vstv %s2337_s6 }
   0x2   :  { %13 = vst [vmem:[#allocation2] sm:$0x1] %v12_v0 }
   0x3   :  { %14 = vsyncpa [#allocation4], 0 }
   0x4   :  { %16 = vsyncpa [#allocation4 + $0x1], 0 }
   0x5   :  { %17 = vsyncpa [#allocation7], 0 }
   0x6   :  { %18 = vsyncpa [#allocation5], 0 }
   0x7   :  { %20 = vsyncpa [#allocation5 + $0x1], 0  ;;  %s1927_s26 = smov 0   ;;  %s1929_s27 = smov 0  }
   0x8   :  { %s1931_s28 = smov 0   ;;  %s1933_s29 = smov 0  }
   0x9 LB: > { %s1948_s6 = sadd.s32 4294967295, %s1872_s29   ;;  %s1368_s30 = sadd.s32 4294967294, %s1872_s29   ;;  %s1872_s29 = sphi %s1933_s29, %s2360_s29   ;;  %s1868_s28 = sphi %s1931_s28, %s2359_s28   ;;  %s1864_s27 = sphi %s1929_s27, %s2358_s27   ;;  %s1860_s26 = sphi %s1927_s26, %s2357_s26  }
   0xa   : > { %p46_p0 = scmp.ne.s32.totalorder %s1864_s27, %s1860_s26  ;;  %p2339_p1 = scmp.eq.s32.totalorder %s1948_s6, 0 }
   0xb   : > { %p202_p3 = scmp.eq.s32.totalorder %s1368_s30, 1  ;;  %p1369_p5 = scmp.ge.s32.totalorder %s1872_s29, 1 }
   0xc   : > { %p1957_p4 = por %p2339_p1, %p46_p0  ;;  %p209_p7 = scmp.lt.s32.totalorder %s1872_s29, 3 }
   0xd   : > { %p1962_p6 = por %p202_p3, %p46_p0  ;;  %s1874_s11 = smov [#allocation6]  }
   0xe   : > { %s2343_s8 = scalar_select %p1957_p4, 1, 0 }
   0xf   : > { %s2344_s9 = scalar_select %p1962_p6, 1, 0 }
  0x10   : > { %p1967_p8 = pnand %p1369_p5, %p209_p7  ;;  %s221_s12 = sshll.u32 %s1874_s11, 4  ;;  %s222_s12 = int_to_ptr.vmem [resolvable:$true] %s221_s12 }
  0x11   : > { %s1875_s14 = smov [#allocation8]   ;;  %s1735_s16 = scalar_lea.vmem %s222_s12, 2048 }
  0x12   : > { %s2345_s10 = scalar_select %p1967_p8, 1, 0 }
  0x13   : > { %p1630_p9 = pneg %p1967_p8  ;;  %s237_s15 = sshll.u32 %s1875_s14, 4  ;;  %s238_s15 = int_to_ptr.vmem [resolvable:$true] %s237_s15 }
  0x14   : > { %p1736_p13 = scmp.ne.s32.totalorder %s222_s12, %s1735_s16  ;;  %p1743_p5 = scmp.lt.s32.totalorder %s222_s12, %s222_s12 }
  0x15   : > { %p1976_p11 = pnand %p1630_p9, %p2339_p1  ;;  %p1744_p7 = scmp.lt.s32.totalorder %s1735_s16, %s1735_s16 }
  0x17   : > { %p1726_p12 = pneg %p1976_p11  ;;  %p1745_p10 = por %p1744_p7, %p1743_p5 }
  0x19   : > { %p1738_p0 = pnand %p1736_p13, %p1726_p12 }
  0x1b   : > { %p1739_p3 = pneg %p1738_p0 }
  0x1d   : > { %p1746_p9 = pnand %p1745_p10, %p1739_p3 }
  0x1f   : > { %1749 = shalt.err (!%p1746_p9)
}
  0x20   : > { %s1876_s17 = smov 64   ;;  %s1877_s18 = smov 4  }
  0x21   : > { %1633 = dma.hbm_to_vmem [thread:$0]  (!%p1976_p11), %s2332_s1, 2048, %s222_s12, [#allocation7], %s1876_s17, %s1876_s17, %s1877_s18  }
  0x22   : > { %s1761_s21 = scalar_lea.vmem %s238_s15, 1024  ;;  %p1769_p2 = scmp.lt.s32.totalorder %s238_s15, %s238_s15 }
  0x23   : > { %p1762_p1 = scmp.ne.s32.totalorder %s238_s15, %s1761_s21  ;;  %p1770_p6 = scmp.lt.s32.totalorder %s1761_s21, %s1761_s21 }
  0x25   : > { %p1764_p13 = pnand %p1762_p1, %p1726_p12  ;;  %p1771_p5 = por %p1770_p6, %p1769_p2 }
  0x27   : > { %p1765_p0 = pneg %p1764_p13 }
  0x29   : > { %p1772_p10 = pnand %p1771_p5, %p1765_p0 }
  0x2b   : > { %1775 = shalt.err (!%p1772_p10)
}
  0x2c   : > { %1636 = dma.hbm_to_vmem [thread:$0]  (!%p1976_p11), %s2334_s3, 1024, %s238_s15, [#allocation7], %s1876_s17, %s1876_s17, %s1877_s18  }
  0x2d   : > { %s1999_s24 = sadd.s32 1, %s1872_s29   ;;  %s33_s25 = sadd.s32 1, %s1868_s28 }
  0x2e   : > { %s30_s30 = ssub.s32 %s1872_s29, %s1999_s24  ;;  %p40_p1 = scmp.ne.s32.totalorder %s1868_s28, %s1864_s27 }
  0x2f   : > { %p31_p2 = scmp.eq.s32.totalorder %s30_s30, 0  ;;  %p41_p6 = scmp.eq.s32.totalorder %s1872_s29, 0 }
  0x30   : > { %p2347_p12 = scmp.eq.s32.totalorder %s1948_s6, 1  ;;  %p1647_p7 = scmp.lt.s32.totalorder %s1872_s29, 2 }
  0x31   : > { %s2015_s12 = scalar_select %p31_p2, %s1868_s28, %s33_s25  }
  0x32   : > { %p2009_p3 = por %p2347_p12, %p40_p1  ;;  %p42_p9 = por %p41_p6, %p40_p1 }
  0x33   : > { %s260_s13 = sand.u32 1, %s1868_s28   ;;  %s1414_s15 = sshll.u32 %s1872_s29, 13 }
  0x34   : > { %s2348_s11 = scalar_select %p2009_p3, 1, 0 }
  0x35   : > { %s1373_s14 = sshll.u32 %s260_s13, 9  ;;  %s2022_s18 = scalar_lea.hbm %s2331_s0, %s1414_s15 }
  0x36   : > { %s264_s19 = scalar_lea.vmem [#allocation3], %s1373_s14  ;;  %p2026_p11 = pnand %p1647_p7, %p42_p9 }
  0x37   : > { %s272_s20 = sshll.u32 %s264_s19, 4  ;;  %s2030_s22 = scalar_lea.sflag [#allocation4], %s260_s13  ;;  %s2024_s20 = int_to_ptr.vmem [resolvable:$true] %s272_s20 }
  0x38   : > { %s1776_s23 = scalar_lea.hbm %s2022_s18, 8192  ;;  %p1778_p0 = pneg %p2026_p11 }
  0x39   : > { %p1777_p13 = scmp.ne.s32.totalorder %s2022_s18, %s1776_s23  ;;  %s1781_s14 = scalar_lea.hbm %s2331_s0, 16384 }
  0x3a   : > { %p1782_p1 = scmp.lt.s32.totalorder %s2022_s18, %s2331_s0  ;;  %p1783_p2 = scmp.lt.s32.totalorder %s1781_s14, %s1776_s23 }
  0x3b   : > { %p1779_p5 = pnand %p1778_p0, %p1777_p13 }
  0x3c   : > { %p1784_p6 = por %p1783_p2, %p1782_p1 }
  0x3d   : > { %p1780_p10 = pneg %p1779_p5 }
  0x3f   : > { %p1785_p12 = pnand %p1784_p6, %p1780_p10 }
  0x41   : > { %1788 = shalt.err (!%p1785_p12)
}
  0x42   : > { %s1789_s13 = scalar_lea.vmem %s2024_s20, 8192  ;;  %s1878_s17 = smov [#allocation3]  }
  0x43   : > { %p1790_p7 = scmp.ne.s32.totalorder %s2024_s20, %s1789_s13  ;;  %s1794_s19 = sshll.u32 %s1878_s17, 4  ;;  %s1795_s19 = int_to_ptr.vmem [resolvable:$false] %s1794_s19 }
  0x44   : > { %s1796_s25 = scalar_lea.vmem %s1795_s19, 16384  ;;  %p1797_p5 = scmp.lt.s32.totalorder %s2024_s20, %s1795_s19 }
  0x45   : > { %p1792_p9 = pnand %p1790_p7, %p1778_p0  ;;  %p1798_p3 = scmp.lt.s32.totalorder %s1796_s25, %s1789_s13 }
  0x47   : > { %p1793_p13 = pneg %p1792_p9  ;;  %p1799_p4 = por %p1798_p3, %p1797_p5 }
  0x49   : > { %p1800_p8 = pnand %p1799_p4, %p1793_p13 }
  0x4b   : > { %1803 = shalt.err (!%p1800_p8)
}
  0x4c   : > { %s1879_s23 = smov 256   ;;  %s1880_s30 = smov 16  }
  0x4d   : > { %1640 = dma.hbm_to_vmem [thread:$0]  (!%p2026_p11), %s2022_s18, 8192, %s2024_s20, %s2030_s22, %s1879_s23, %s1879_s23, %s1880_s30  }
  0x4e   : > { %p2350_p0 = scmp.ne.s32.totalorder %s2345_s10, 0 }
  0x4f   : > { %s2054_s14 = sand.u32 (!%p2350_p0), 1, %s1864_s27   ;;  %p2351_p4 = scmp.ne.s32.totalorder (!%p2350_p0), %s2343_s8, 0 }
  0x50   : > { %284 = sbr.rel (%p2350_p0) target bundleno = 968 (0x3c8), region = 48  ;;  %s1378_s15 = sshll.u32 (!%p2350_p0), %s2054_s14, 9 }
  0x51   : > { %s287_s16 = scalar_lea.sflag (!%p2350_p0), [#allocation4], %s2054_s14  ;;  %s2058_s13 = scalar_lea.vmem (!%p2350_p0), [#allocation3], %s1378_s15 }
  0x55   : > { %1847 = dma.done.wait (%p2351_p4), %s287_s16, 8192  }
  0x56   : > { %1849 = vsyncadd (%p2351_p4), %s287_s16, 4294959104  ;;  %p2352_p8 = scmp.eq.s32.totalorder %s1948_s6, 0 }
  0x58   : > { %1851 = dma.done.wait (%p2352_p8), [#allocation7], 3072   ;;  %p2353_p3 = pmov %p2352_p8 }
  0x59   : > { %v1692_v1 = vld [vmem:[#allocation6 + $0x78] sm:$0xff]   ;;  %v1694_v3 = vld [vmem:[#allocation6 + $0x70] sm:$0xff]   ;;  %v1696_v5 = vld [vmem:[#allocation6 + $0x68] sm:$0xff]   ;;  %s1381_s17 = sshll.u32 %s2054_s14, 1  ;;  %s1415_s19 = sshll.u32 %s1948_s6, 5 }
  0x5a   : > { %1853 = vsyncadd (%p2353_p3), [#allocation7], 4294964224  ;;  %v1693_v2 = vld [vmem:[#allocation6 + $0x38] sm:$0xff]   ;;  %1416 = vmatprep.subr.bf16.mxu0 %v1692_v1  ;;  %v1695_v4 = vld [vmem:[#allocation6 + $0x30] sm:$0xff]   ;;  %s328_s25 = scalar_lea.vmem [#allocation9], %s1381_s17  ;;  %s1277_s16 = scalar_lea.hbm %s2338_s7, %s1415_s19 }
  0x5b   : > { %1417 = vmatpush3.bf16.msra.mxu0 %v1693_v2  ;;  %v1697_v6 = vld [vmem:[#allocation6 + $0x28] sm:$0xff]   ;;  %v1698_v7 = vld [vmem:[#allocation6 + $0x60] sm:$0xff]   ;;  %v1700_v9 = vld [vmem:[#allocation6 + $0x58] sm:$0xff]   ;;  %s1279_s23 = sshll.u32 %s328_s25, 4  ;;  %p2354_p10 = scmp.ne.s32.totalorder %s2348_s11, 0  ;;  %s1280_s23 = int_to_ptr.vmem [resolvable:$true] %s1279_s23 }
  0x5c   : > { %1418 = vmatprep.subr.bf16.mxu0 %v1694_v3  ;;  %v1699_v8 = vld [vmem:[#allocation6 + $0x20] sm:$0xff]   ;;  %v1701_v10 = vld [vmem:[#allocation6 + $0x18] sm:$0xff]   ;;  %v1702_v11 = vld [vmem:[#allocation6 + $0x50] sm:$0xff]   ;;  %s1804_s8 = scalar_lea.vmem %s1280_s23, 32  ;;  %s1883_s10 = smov [#allocation9]  }
  0x5d   : > { %v332_v12 = vld [vmem:[%s2058_s13 + $0x8] sm:$0xff]  ;;  %v334_v13 = vld [vmem:[%s2058_s13 + $0x18] sm:$0xff]  ;;  %v1703_v15 = vld [vmem:[#allocation6 + $0x10] sm:$0xff]   ;;  %p1805_p11 = scmp.ne.s32.totalorder %s1280_s23, %s1804_s8  ;;  %s1808_s18 = sshll.u32 %s1883_s10, 4  ;;  %s1809_s18 = int_to_ptr.vmem [resolvable:$false] %s1808_s18 }
  0x5e   : > { %v396_v14 = vpack.c.bf16 %v334_v13, %v332_v12  ;;  %v1704_v16 = vld [vmem:[#allocation6 + $0x48] sm:$0xff]   ;;  %v1706_v18 = vld [vmem:[#allocation6 + $0x40] sm:$0xff]   ;;  %v333_v21 = vld [vmem:[%s2058_s13 + $0x10] sm:$0xff]  ;;  %s1810_s6 = scalar_lea.vmem %s1809_s18, 64  ;;  %p1811_p6 = scmp.lt.s32.totalorder %s1280_s23, %s1809_s18 }
  0x5f   : > { %1419 = vmatpush3.bf16.msra.mxu0 %v1695_v4  ;;  %v1705_v17 = vld [vmem:[#allocation6 + $0x8] sm:$0xff]   ;;  %v1707_v19 = vld [vmem:[#allocation6] sm:$0xff]   ;;  %v338_v23 = vld [vmem:[%s2058_s13 + $0x38] sm:$0xff]  ;;  %p1806_p1 = pnand %p1805_p11, %p2354_p10  ;;  %p1812_p12 = scmp.lt.s32.totalorder %s1810_s6, %s1804_s8 }
  0x60   : > { %1420 = vmatprep.subr.bf16.mxu0 %v1696_v5  ;;  %594 = vmatprep.mubr.bf16.mxu0 %v396_v14  ;;  %v331_v20 = vld [vmem:[%s2058_s13] sm:$0xff]  ;;  %v336_v22 = vld [vmem:[%s2058_s13 + $0x28] sm:$0xff]  ;;  %v337_v27 = vld [vmem:[%s2058_s13 + $0x30] sm:$0xff] }
  0x61   : > { %v395_v24 = vpack.c.bf16 %v333_v21, %v331_v20  ;;  %v398_v25 = vpack.c.bf16 %v338_v23, %v336_v22  ;;  %v335_v26 = vld [vmem:[%s2058_s13 + $0x20] sm:$0xff]  ;;  %v340_v28 = vld [vmem:[%s2058_s13 + $0x48] sm:$0xff]  ;;  %v342_v29 = vld [vmem:[%s2058_s13 + $0x58] sm:$0xff]  ;;  %p1807_p2 = pneg %p1806_p1  ;;  %p1813_p7 = por %p1812_p12, %p1811_p6 }
  0x62   : > { %v397_v30 = vpack.c.bf16 %v337_v27, %v335_v26  ;;  %v1708_v31 = vld [vmem:[#allocation8 + $0x38] sm:$0xff]   ;;  %v400_v32 = vpack.c.bf16 %v342_v29, %v340_v28  ;;  %v1709_v33 = vld [vmem:[#allocation8 + $0x30] sm:$0xff]   ;;  %v339_v34 = vld [vmem:[%s2058_s13 + $0x40] sm:$0xff] }
  0x63   : > { %1421 = vmatpush3.bf16.msra.mxu0 %v1697_v6  ;;  %1570 = vmatprep.subr.bf16.mxu1 %v1708_v31  ;;  %v341_v35 = vld [vmem:[%s2058_s13 + $0x50] sm:$0xff]  ;;  %v344_v36 = vld [vmem:[%s2058_s13 + $0x68] sm:$0xff]  ;;  %v346_v37 = vld [vmem:[%s2058_s13 + $0x78] sm:$0xff]  ;;  %p1814_p9 = pnand %p1813_p7, %p1807_p2 }
  0x64   : > { %1422 = vmatprep.subr.bf16.mxu0 %v1698_v7  ;;  %1571 = vmatpush3.bf16.msra.mxu1 %v1708_v31  ;;  %v399_v38 = vpack.c.bf16 %v341_v35, %v339_v34  ;;  %v402_v39 = vpack.c.bf16 %v346_v37, %v344_v36  ;;  %v343_v40 = vld [vmem:[%s2058_s13 + $0x60] sm:$0xff]  ;;  %v345_v41 = vld [vmem:[%s2058_s13 + $0x70] sm:$0xff]  ;;  %v348_v42 = vld [vmem:[%s2058_s13 + $0x88] sm:$0xff] }
  0x65   : > { %1572 = vmatprep.subr.bf16.mxu1 %v1709_v33  ;;  %v350_v43 = vld [vmem:[%s2058_s13 + $0x98] sm:$0xff]  ;;  %v401_v44 = vpack.c.bf16 %v345_v41, %v343_v40  ;;  %v347_v46 = vld [vmem:[%s2058_s13 + $0x80] sm:$0xff]  ;;  %v349_v47 = vld [vmem:[%s2058_s13 + $0x90] sm:$0xff] }
  0x66   : > { %v404_v45 = vpack.c.bf16 %v350_v43, %v348_v42  ;;  %v352_v48 = vld [vmem:[%s2058_s13 + $0xa8] sm:$0xff]  ;;  %v354_v49 = vld [vmem:[%s2058_s13 + $0xb8] sm:$0xff]  ;;  %v403_v50 = vpack.c.bf16 %v349_v47, %v347_v46  ;;  %v351_v52 = vld [vmem:[%s2058_s13 + $0xa0] sm:$0xff] }
  0x67   : > { %1423 = vmatpush3.bf16.msra.mxu0 %v1699_v8  ;;  %v406_v51 = vpack.c.bf16 %v354_v49, %v352_v48  ;;  %v353_v53 = vld [vmem:[%s2058_s13 + $0xb0] sm:$0xff]  ;;  %v356_v54 = vld [vmem:[%s2058_s13 + $0xc8] sm:$0xff]  ;;  %v358_v55 = vld [vmem:[%s2058_s13 + $0xd8] sm:$0xff] }
  0x68   : > { %1424 = vmatprep.subr.bf16.mxu0 %v1700_v9  ;;  %1573 = vmatpush3.bf16.msra.mxu1 %v1709_v33  ;;  %v405_v56 = vpack.c.bf16 %v353_v53, %v351_v52  ;;  %v408_v57 = vpack.c.bf16 %v358_v55, %v356_v54  ;;  %v355_v58 = vld [vmem:[%s2058_s13 + $0xc0] sm:$0xff]  ;;  %v357_v59 = vld [vmem:[%s2058_s13 + $0xd0] sm:$0xff]  ;;  %v360_v60 = vld [vmem:[%s2058_s13 + $0xe8] sm:$0xff] }
  0x69   : > { %v362_v61 = vld [vmem:[%s2058_s13 + $0xf8] sm:$0xff]  ;;  %v407_v62 = vpack.c.bf16 %v357_v59, %v355_v58  ;;  %v359_v0 = vld [vmem:[%s2058_s13 + $0xe0] sm:$0xff]  ;;  %v361_v1 = vld [vmem:[%s2058_s13 + $0xf0] sm:$0xff] }
  0x6a   : > { %v410_v63 = vpack.c.bf16 %v362_v61, %v360_v60  ;;  %v364_v2 = vld [vmem:[%s2058_s13 + $0x108] sm:$0xff]  ;;  %v366_v3 = vld [vmem:[%s2058_s13 + $0x118] sm:$0xff]  ;;  %v409_v4 = vpack.c.bf16 %v361_v1, %v359_v0  ;;  %v363_v6 = vld [vmem:[%s2058_s13 + $0x100] sm:$0xff] }
  0x6b   : > { %1425 = vmatpush3.bf16.msra.mxu0 %v1701_v10  ;;  %v412_v5 = vpack.c.bf16 %v366_v3, %v364_v2  ;;  %v365_v7 = vld [vmem:[%s2058_s13 + $0x110] sm:$0xff]  ;;  %v368_v8 = vld [vmem:[%s2058_s13 + $0x128] sm:$0xff]  ;;  %v370_v9 = vld [vmem:[%s2058_s13 + $0x138] sm:$0xff] }
  0x6c   : > { %1426 = vmatprep.subr.bf16.mxu0 %v1702_v11  ;;  %v411_v10 = vpack.c.bf16 %v365_v7, %v363_v6  ;;  %v414_v11 = vpack.c.bf16 %v370_v9, %v368_v8  ;;  %v1710_v12 = vld [vmem:[#allocation8 + $0x28] sm:$0xff]   ;;  %v367_v13 = vld [vmem:[%s2058_s13 + $0x120] sm:$0xff]  ;;  %v369_v14 = vld [vmem:[%s2058_s13 + $0x130] sm:$0xff] }
  0x6d   : > { %1574 = vmatprep.subr.bf16.mxu1 %v1710_v12  ;;  %v1712_v20 = vld [vmem:[#allocation8 + $0x18] sm:$0xff]   ;;  %v371_v21 = vld [vmem:[%s2058_s13 + $0x140] sm:$0xff]  ;;  %v373_v22 = vld [vmem:[%s2058_s13 + $0x150] sm:$0xff] }
  0x6e   : > { %1575 = vmatpush3.bf16.msra.mxu1 %v1710_v12  ;;  %v376_v23 = vld [vmem:[%s2058_s13 + $0x168] sm:$0xff]  ;;  %v415_v26 = vpack.c.bf16 %v373_v22, %v371_v21  ;;  %v375_v29 = vld [vmem:[%s2058_s13 + $0x160] sm:$0xff]  ;;  %v381_v37 = vld [vmem:[%s2058_s13 + $0x190] sm:$0xff] }
  0x6f   : > { %1427 = vmatpush3.bf16.msra.mxu0 %v1703_v15  ;;  %v372_v15 = vld [vmem:[%s2058_s13 + $0x148] sm:$0xff]  ;;  %v1715_v33 = vld [vmem:[#allocation8] sm:$0xff]   ;;  %v385_v43 = vld [vmem:[%s2058_s13 + $0x1b0] sm:$0xff] }
  0x70   : > { %1428 = vmatprep.subr.bf16.mxu0 %v1704_v16  ;;  %v374_v16 = vld [vmem:[%s2058_s13 + $0x158] sm:$0xff]  ;;  %v1714_v28 = vld [vmem:[#allocation8 + $0x8] sm:$0xff]   ;;  %v379_v36 = vld [vmem:[%s2058_s13 + $0x180] sm:$0xff] }
  0x71   : > { %v380_v31 = vld [vmem:[%s2058_s13 + $0x188] sm:$0xff]  ;;  %v419_v40 = vpack.c.bf16 %v381_v37, %v379_v36  ;;  %v383_v42 = vld [vmem:[%s2058_s13 + $0x1a0] sm:$0xff]  ;;  %v389_v49 = vld [vmem:[%s2058_s13 + $0x1d0] sm:$0xff] }
  0x72   : > { %v421_v46 = vpack.c.bf16 %v385_v43, %v383_v42  ;;  %v387_v48 = vld [vmem:[%s2058_s13 + $0x1c0] sm:$0xff]  ;;  %v393_v55 = vld [vmem:[%s2058_s13 + $0x1f0] sm:$0xff]  ;;  %v2135_v58 = vld [vmem:[%s2333_s2] ss:$0 sm:$0xff] }
  0x73   : > { %1429 = vmatpush3.bf16.msra.mxu0 %v1705_v17  ;;  %v1711_v17 = vld [vmem:[#allocation8 + $0x20] sm:$0xff]   ;;  %v423_v52 = vpack.c.bf16 %v389_v49, %v387_v48 }
  0x74   : > { %1430 = vmatprep.subr.bf16.mxu0 %v1706_v18  ;;  %v413_v18 = vpack.c.bf16 %v369_v14, %v367_v13  ;;  %1576 = vmatprep.subr.bf16.mxu1 %v1711_v17  ;;  %v391_v54 = vld [vmem:[%s2058_s13 + $0x1e0] sm:$0xff] }
  0x75   : > { %1577 = vmatpush3.bf16.msra.mxu1 %v1711_v17 }
  0x76   : > { %1578 = vmatprep.subr.bf16.mxu1 %v1712_v20 }
  0x77   : > { %1431 = vmatpush3.bf16.msra.mxu0 %v1707_v19  ;;  %v416_v19 = vpack.c.bf16 %v374_v16, %v372_v15 }
  0x79   : > { %1579 = vmatpush3.bf16.msra.mxu1 %v1712_v20 }
  0x7a   : > { %595 = vmatmul.mubr.bf16.vlgmr.msra.gmra.mxu0 %v395_v24  ;;  %v378_v24 = vld [vmem:[%s2058_s13 + $0x178] sm:$0xff] }
  0x7b   : > { %602 = vmatprep.mubr.bf16.mxu0 %v398_v25  ;;  %v1713_v25 = vld [vmem:[#allocation8 + $0x10] sm:$0xff]   ;;  %v418_v27 = vpack.c.bf16 %v378_v24, %v376_v23 }
  0x7c   : > { %1580 = vmatprep.subr.bf16.mxu1 %v1713_v25 }
  0x7d   : > { %1581 = vmatpush3.bf16.msra.mxu1 %v1713_v25 }
  0x7e   : > { %1582 = vmatprep.subr.bf16.mxu1 %v1714_v28 }
  0x81   : > { %1583 = vmatpush3.bf16.msra.mxu1 %v1714_v28 }
  0x82   : > { %603 = vmatmul.mubr.bf16.gmra.mxu0 %v397_v30  ;;  %v377_v30 = vld [vmem:[%s2058_s13 + $0x170] sm:$0xff]  ;;  %1584 = vmatprep.subr.bf16.mxu1 %v1715_v33 }
  0x83   : > { %610 = vmatprep.mubr.bf16.mxu0 %v400_v32  ;;  %v382_v32 = vld [vmem:[%s2058_s13 + $0x198] sm:$0xff]  ;;  %v417_v34 = vpack.c.bf16 %v377_v30, %v375_v29 }
  0x84   : > { %v420_v35 = vpack.c.bf16 %v382_v32, %v380_v31 }
  0x85   : > { %1585 = vmatpush3.bf16.msra.mxu1 %v1715_v33 }
  0x8a   : > { %611 = vmatmul.mubr.bf16.gmra.mxu0 %v399_v38  ;;  %v384_v38 = vld [vmem:[%s2058_s13 + $0x1a8] sm:$0xff] }
  0x8b   : > { %618 = vmatprep.mubr.bf16.mxu0 %v402_v39  ;;  %v386_v39 = vld [vmem:[%s2058_s13 + $0x1b8] sm:$0xff] }
  0x8c   : > { %v422_v41 = vpack.c.bf16 %v386_v39, %v384_v38 }
  0x92   : > { %619 = vmatmul.mubr.bf16.gmra.mxu0 %v401_v44  ;;  %v388_v44 = vld [vmem:[%s2058_s13 + $0x1c8] sm:$0xff] }
  0x93   : > { %626 = vmatprep.mubr.bf16.mxu0 %v404_v45  ;;  %v390_v45 = vld [vmem:[%s2058_s13 + $0x1d8] sm:$0xff] }
  0x94   : > { %v424_v47 = vpack.c.bf16 %v390_v45, %v388_v44 }
  0x9a   : > { %627 = vmatmul.mubr.bf16.gmra.mxu0 %v403_v50  ;;  %v392_v50 = vld [vmem:[%s2058_s13 + $0x1e8] sm:$0xff] }
  0x9b   : > { %634 = vmatprep.mubr.bf16.mxu0 %v406_v51  ;;  %v394_v51 = vld [vmem:[%s2058_s13 + $0x1f8] sm:$0xff]  ;;  %s1265_s13 = scalar_lea.sflag [#allocation5], %s2054_s14 }
  0x9c   : > { %v426_v53 = vpack.c.bf16 %v394_v51, %v392_v50 }
  0xa2   : > { %635 = vmatmul.mubr.bf16.gmra.mxu0 %v405_v56  ;;  %v425_v56 = vpack.c.bf16 %v393_v55, %v391_v54 }
  0xa3   : > { %642 = vmatprep.mubr.bf16.mxu0 %v408_v57 }
  0xaa   : > { %643 = vmatmul.mubr.bf16.gmra.mxu0 %v407_v62 }
  0xab   : > { %650 = vmatprep.mubr.bf16.mxu0 %v410_v63 }
  0xb2   : > { %651 = vmatmul.mubr.bf16.gmra.mxu0 %v409_v4 }
  0xb3   : > { %658 = vmatprep.mubr.bf16.mxu0 %v412_v5 }
  0xba   : > { %659 = vmatmul.mubr.bf16.gmra.mxu0 %v411_v10 }
  0xbb   : > { %666 = vmatprep.mubr.bf16.mxu0 %v414_v11 }
  0xc2   : > { %667 = vmatmul.mubr.bf16.gmra.mxu0 %v413_v18 }
  0xc3   : > { %674 = vmatprep.mubr.bf16.mxu0 %v416_v19 }
  0xca   : > { %675 = vmatmul.mubr.bf16.gmra.mxu0 %v415_v26 }
  0xcb   : > { %682 = vmatprep.mubr.bf16.mxu0 %v418_v27 }
  0xd2   : > { %683 = vmatmul.mubr.bf16.gmra.mxu0 %v417_v34 }
  0xd3   : > { %690 = vmatprep.mubr.bf16.mxu0 %v420_v35 }
  0xda   : > { %691 = vmatmul.mubr.bf16.gmra.mxu0 %v419_v40 }
  0xdb   : > { %698 = vmatprep.mubr.bf16.mxu0 %v422_v41 }
  0xe2   : > { %699 = vmatmul.mubr.bf16.gmra.mxu0 %v421_v46 }
  0xe3   : > { %706 = vmatprep.mubr.bf16.mxu0 %v424_v47 }
  0xea   : > { %707 = vmatmul.mubr.bf16.gmra.mxu0 %v423_v52 }
  0xeb   : > { %714 = vmatprep.mubr.bf16.mxu0 %v426_v53 }
  0xf2   : > { %715 = vmatmul.mubr.bf16.gmra.mxu0 %v425_v56 }
 0x13a   : > { %v1432_v57 = vpop.f32.mrf.mxu0 }
 0x13c   : > { %v1433_v59 = vpop.f32.mrf.mxu0 }
 0x13d   : > { %v1434_v60 = vadd.f32 %v1433_v59, %v1432_v57 }
 0x13e   : > { %v1435_v61 = vpop.f32.mrf.mxu0 }
 0x13f   : > { %v597_v62 = vadd.f32 %v1434_v60, %v2135_v58 }
 0x140   : > { %v1436_v63 = vpop.f32.mrf.mxu0 }
 0x141   : > { %v1437_v0 = vadd.f32 %v1436_v63, %v1435_v61  ;;  %v755_v3 = vmul.f32 0.2, %v597_v62  ;;  %vm723_vm0 = vcmp.gt.f32.partialorder %v597_v62, 0.0 }
 0x142   : > { %v1438_v1 = vpop.f32.mrf.mxu0 }
 0x143   : > { %v600_v2 = vadd.f32 %v1437_v0, %v2135_v58  ;;  %v787_v9 = vsel %vm723_vm0, %v597_v62, %v755_v3 }
 0x144   : > { %v1439_v4 = vpop.f32.mrf.mxu0 }
 0x145   : > { %v1440_v5 = vadd.f32 %v1439_v4, %v1438_v1  ;;  %vm724_vm1 = vcmp.gt.f32.partialorder %v600_v2, 0.0  ;;  %v756_v6 = vmul.f32 0.2, %v600_v2 }
 0x146   : > { %v1441_v7 = vpop.f32.mrf.mxu0 }
 0x147   : > { %v605_v8 = vadd.f32 %v1440_v5, %v2135_v58  ;;  %v788_v10 = vsel %vm724_vm1, %v600_v2, %v756_v6 }
 0x148   : > { %v1442_v11 = vpop.f32.mrf.mxu0  ;;  %v819_v12 = vpack.c.bf16 %v788_v10, %v787_v9 }
 0x149   : > { %v1443_v13 = vadd.f32 %v1442_v11, %v1441_v7  ;;  %v757_v15 = vmul.f32 0.2, %v605_v8  ;;  %vm725_vm2 = vcmp.gt.f32.partialorder %v605_v8, 0.0 }
 0x14a   : > { %v1444_v14 = vpop.f32.mrf.mxu0  ;;  %1586 = vmatprep.mubr.bf16.mxu1 %v819_v12 }
 0x14b   : > { %v608_v16 = vadd.f32 %v1443_v13, %v2135_v58  ;;  %v789_v22 = vsel %vm725_vm2, %v605_v8, %v757_v15 }
 0x14c   : > { %v1445_v17 = vpop.f32.mrf.mxu0 }
 0x14d   : > { %vm726_vm3 = vcmp.gt.f32.partialorder %v608_v16, 0.0  ;;  %v758_v18 = vmul.f32 0.2, %v608_v16  ;;  %v1446_v19 = vadd.f32 %v1445_v17, %v1444_v14 }
 0x14e   : > { %v1447_v20 = vpop.f32.mrf.mxu0 }
 0x14f   : > { %v613_v21 = vadd.f32 %v1446_v19, %v2135_v58  ;;  %v790_v23 = vsel %vm726_vm3, %v608_v16, %v758_v18 }
 0x150   : > { %v1448_v24 = vpop.f32.mrf.mxu0  ;;  %v820_v25 = vpack.c.bf16 %v790_v23, %v789_v22 }
 0x151   : > { %v1449_v26 = vadd.f32 %v1448_v24, %v1447_v20  ;;  %v759_v28 = vmul.f32 0.2, %v613_v21  ;;  %vm727_vm4 = vcmp.gt.f32.partialorder %v613_v21, 0.0 }
 0x152   : > { %v1450_v27 = vpop.f32.mrf.mxu0  ;;  %1587 = vmatmul.mubr.bf16.vlgmr.msra.gmra.mxu1 %v820_v25 }
 0x153   : > { %v616_v29 = vadd.f32 %v1449_v26, %v2135_v58  ;;  %v791_v35 = vsel %vm727_vm4, %v613_v21, %v759_v28 }
 0x154   : > { %v1451_v30 = vpop.f32.mrf.mxu0 }
 0x155   : > { %vm728_vm5 = vcmp.gt.f32.partialorder %v616_v29, 0.0  ;;  %v760_v31 = vmul.f32 0.2, %v616_v29  ;;  %v1452_v32 = vadd.f32 %v1451_v30, %v1450_v27 }
 0x156   : > { %v1453_v33 = vpop.f32.mrf.mxu0 }
 0x157   : > { %v621_v34 = vadd.f32 %v1452_v32, %v2135_v58  ;;  %v792_v36 = vsel %vm728_vm5, %v616_v29, %v760_v31 }
 0x158   : > { %v1454_v37 = vpop.f32.mrf.mxu0  ;;  %v821_v38 = vpack.c.bf16 %v792_v36, %v791_v35 }
 0x159   : > { %v1455_v39 = vadd.f32 %v1454_v37, %v1453_v33  ;;  %v761_v41 = vmul.f32 0.2, %v621_v34  ;;  %vm729_vm6 = vcmp.gt.f32.partialorder %v621_v34, 0.0 }
 0x15a   : > { %v1456_v40 = vpop.f32.mrf.mxu0  ;;  %1590 = vmatprep.mubr.bf16.mxu1 %v821_v38 }
 0x15b   : > { %v624_v42 = vadd.f32 %v1455_v39, %v2135_v58  ;;  %v793_v48 = vsel %vm729_vm6, %v621_v34, %v761_v41 }
 0x15c   : > { %v1457_v43 = vpop.f32.mrf.mxu0 }
 0x15d   : > { %vm730_vm7 = vcmp.gt.f32.partialorder %v624_v42, 0.0  ;;  %v762_v44 = vmul.f32 0.2, %v624_v42  ;;  %v1458_v45 = vadd.f32 %v1457_v43, %v1456_v40 }
 0x15e   : > { %v1459_v46 = vpop.f32.mrf.mxu0 }
 0x15f   : > { %v629_v47 = vadd.f32 %v1458_v45, %v2135_v58  ;;  %v794_v49 = vsel %vm730_vm7, %v624_v42, %v762_v44 }
 0x160   : > { %v1460_v50 = vpop.f32.mrf.mxu0  ;;  %v822_v51 = vpack.c.bf16 %v794_v49, %v793_v48 }
 0x161   : > { %v1461_v52 = vadd.f32 %v1460_v50, %v1459_v46  ;;  %v763_v54 = vmul.f32 0.2, %v629_v47  ;;  %vm731_vm8 = vcmp.gt.f32.partialorder %v629_v47, 0.0 }
 0x162   : > { %v1462_v53 = vpop.f32.mrf.mxu0  ;;  %1591 = vmatmul.mubr.bf16.gmra.mxu1 %v822_v51 }
 0x163   : > { %v632_v55 = vadd.f32 %v1461_v52, %v2135_v58  ;;  %v795_v62 = vsel %vm731_vm8, %v629_v47, %v763_v54 }
 0x164   : > { %v1463_v56 = vpop.f32.mrf.mxu0 }
 0x165   : > { %vm732_vm9 = vcmp.gt.f32.partialorder %v632_v55, 0.0  ;;  %v764_v57 = vmul.f32 0.2, %v632_v55  ;;  %v1464_v59 = vadd.f32 %v1463_v56, %v1462_v53 }
 0x166   : > { %v1465_v60 = vpop.f32.mrf.mxu0 }
 0x167   : > { %v637_v61 = vadd.f32 %v1464_v59, %v2135_v58  ;;  %v796_v63 = vsel %vm732_vm9, %v632_v55, %v764_v57 }
 0x168   : > { %v1466_v0 = vpop.f32.mrf.mxu0  ;;  %v823_v1 = vpack.c.bf16 %v796_v63, %v795_v62 }
 0x169   : > { %v1467_v2 = vadd.f32 %v1466_v0, %v1465_v60  ;;  %v765_v4 = vmul.f32 0.2, %v637_v61  ;;  %vm733_vm10 = vcmp.gt.f32.partialorder %v637_v61, 0.0 }
 0x16a   : > { %v1468_v3 = vpop.f32.mrf.mxu0  ;;  %1594 = vmatprep.mubr.bf16.mxu1 %v823_v1 }
 0x16b   : > { %v640_v5 = vadd.f32 %v1467_v2, %v2135_v58  ;;  %v797_v11 = vsel %vm733_vm10, %v637_v61, %v765_v4 }
 0x16c   : > { %v1469_v6 = vpop.f32.mrf.mxu0 }
 0x16d   : > { %vm734_vm11 = vcmp.gt.f32.partialorder %v640_v5, 0.0  ;;  %v766_v7 = vmul.f32 0.2, %v640_v5  ;;  %v1470_v8 = vadd.f32 %v1469_v6, %v1468_v3 }
 0x16e   : > { %v1471_v9 = vpop.f32.mrf.mxu0 }
 0x16f   : > { %v645_v10 = vadd.f32 %v1470_v8, %v2135_v58  ;;  %v798_v12 = vsel %vm734_vm11, %v640_v5, %v766_v7 }
 0x170   : > { %v1472_v13 = vpop.f32.mrf.mxu0  ;;  %v824_v14 = vpack.c.bf16 %v798_v12, %v797_v11 }
 0x171   : > { %v1473_v15 = vadd.f32 %v1472_v13, %v1471_v9  ;;  %v767_v17 = vmul.f32 0.2, %v645_v10  ;;  %vm735_vm12 = vcmp.gt.f32.partialorder %v645_v10, 0.0 }
 0x172   : > { %v1474_v16 = vpop.f32.mrf.mxu0  ;;  %1595 = vmatmul.mubr.bf16.gmra.mxu1 %v824_v14 }
 0x173   : > { %v648_v18 = vadd.f32 %v1473_v15, %v2135_v58  ;;  %v799_v24 = vsel %vm735_vm12, %v645_v10, %v767_v17 }
 0x174   : > { %v1475_v19 = vpop.f32.mrf.mxu0 }
 0x175   : > { %vm736_vm13 = vcmp.gt.f32.partialorder %v648_v18, 0.0  ;;  %v768_v20 = vmul.f32 0.2, %v648_v18  ;;  %v1476_v21 = vadd.f32 %v1475_v19, %v1474_v16 }
 0x176   : > { %v1477_v22 = vpop.f32.mrf.mxu0 }
 0x177   : > { %v653_v23 = vadd.f32 %v1476_v21, %v2135_v58  ;;  %v800_v25 = vsel %vm736_vm13, %v648_v18, %v768_v20 }
 0x178   : > { %v1478_v26 = vpop.f32.mrf.mxu0  ;;  %v825_v27 = vpack.c.bf16 %v800_v25, %v799_v24 }
 0x179   : > { %v1479_v28 = vadd.f32 %v1478_v26, %v1477_v22  ;;  %v769_v30 = vmul.f32 0.2, %v653_v23  ;;  %vm737_vm14 = vcmp.gt.f32.partialorder %v653_v23, 0.0 }
 0x17a   : > { %v1480_v29 = vpop.f32.mrf.mxu0  ;;  %1598 = vmatprep.mubr.bf16.mxu1 %v825_v27 }
 0x17b   : > { %v656_v31 = vadd.f32 %v1479_v28, %v2135_v58  ;;  %v801_v37 = vsel %vm737_vm14, %v653_v23, %v769_v30 }
 0x17c   : > { %v1481_v32 = vpop.f32.mrf.mxu0 }
 0x17d   : > { %vm738_vm15 = vcmp.gt.f32.partialorder %v656_v31, 0.0  ;;  %v770_v33 = vmul.f32 0.2, %v656_v31  ;;  %v1482_v34 = vadd.f32 %v1481_v32, %v1480_v29 }
 0x17e   : > { %v1483_v35 = vpop.f32.mrf.mxu0 }
 0x17f   : > { %v661_v36 = vadd.f32 %v1482_v34, %v2135_v58  ;;  %v802_v38 = vsel %vm738_vm15, %v656_v31, %v770_v33 }
 0x180   : > { %v1484_v39 = vpop.f32.mrf.mxu0  ;;  %v826_v40 = vpack.c.bf16 %v802_v38, %v801_v37 }
 0x181   : > { %v1485_v41 = vadd.f32 %v1484_v39, %v1483_v35  ;;  %v771_v43 = vmul.f32 0.2, %v661_v36  ;;  %vm739_vm0 = vcmp.gt.f32.partialorder %v661_v36, 0.0 }
 0x182   : > { %v1486_v42 = vpop.f32.mrf.mxu0  ;;  %1599 = vmatmul.mubr.bf16.gmra.mxu1 %v826_v40 }
 0x183   : > { %v664_v44 = vadd.f32 %v1485_v41, %v2135_v58  ;;  %v803_v50 = vsel %vm739_vm0, %v661_v36, %v771_v43 }
 0x184   : > { %v1487_v45 = vpop.f32.mrf.mxu0 }
 0x185   : > { %vm740_vm1 = vcmp.gt.f32.partialorder %v664_v44, 0.0  ;;  %v772_v46 = vmul.f32 0.2, %v664_v44  ;;  %v1488_v47 = vadd.f32 %v1487_v45, %v1486_v42 }
 0x186   : > { %v1489_v48 = vpop.f32.mrf.mxu0 }
 0x187   : > { %v669_v49 = vadd.f32 %v1488_v47, %v2135_v58  ;;  %v804_v51 = vsel %vm740_vm1, %v664_v44, %v772_v46 }
 0x188   : > { %v1490_v52 = vpop.f32.mrf.mxu0  ;;  %v827_v53 = vpack.c.bf16 %v804_v51, %v803_v50 }
 0x189   : > { %v1491_v54 = vadd.f32 %v1490_v52, %v1489_v48  ;;  %v773_v56 = vmul.f32 0.2, %v669_v49  ;;  %vm741_vm2 = vcmp.gt.f32.partialorder %v669_v49, 0.0 }
 0x18a   : > { %v1492_v55 = vpop.f32.mrf.mxu0  ;;  %1602 = vmatprep.mubr.bf16.mxu1 %v827_v53 }
 0x18b   : > { %v672_v57 = vadd.f32 %v1491_v54, %v2135_v58  ;;  %v805_v0 = vsel %vm741_vm2, %v669_v49, %v773_v56 }
 0x18c   : > { %v1493_v59 = vpop.f32.mrf.mxu0 }
 0x18d   : > { %vm742_vm3 = vcmp.gt.f32.partialorder %v672_v57, 0.0  ;;  %v774_v60 = vmul.f32 0.2, %v672_v57  ;;  %v1494_v61 = vadd.f32 %v1493_v59, %v1492_v55 }
 0x18e   : > { %v1495_v62 = vpop.f32.mrf.mxu0 }
 0x18f   : > { %v677_v63 = vadd.f32 %v1494_v61, %v2135_v58  ;;  %v806_v1 = vsel %vm742_vm3, %v672_v57, %v774_v60 }
 0x190   : > { %v1496_v2 = vpop.f32.mrf.mxu0  ;;  %v828_v3 = vpack.c.bf16 %v806_v1, %v805_v0 }
 0x191   : > { %v1497_v4 = vadd.f32 %v1496_v2, %v1495_v62  ;;  %v775_v6 = vmul.f32 0.2, %v677_v63  ;;  %vm743_vm4 = vcmp.gt.f32.partialorder %v677_v63, 0.0 }
 0x192   : > { %v1498_v5 = vpop.f32.mrf.mxu0  ;;  %1603 = vmatmul.mubr.bf16.gmra.mxu1 %v828_v3 }
 0x193   : > { %v680_v7 = vadd.f32 %v1497_v4, %v2135_v58  ;;  %v807_v13 = vsel %vm743_vm4, %v677_v63, %v775_v6 }
 0x194   : > { %v1499_v8 = vpop.f32.mrf.mxu0 }
 0x195   : > { %vm744_vm5 = vcmp.gt.f32.partialorder %v680_v7, 0.0  ;;  %v776_v9 = vmul.f32 0.2, %v680_v7  ;;  %v1500_v10 = vadd.f32 %v1499_v8, %v1498_v5 }
 0x196   : > { %v1501_v11 = vpop.f32.mrf.mxu0 }
 0x197   : > { %v685_v12 = vadd.f32 %v1500_v10, %v2135_v58  ;;  %v808_v14 = vsel %vm744_vm5, %v680_v7, %v776_v9 }
 0x198   : > { %v1502_v15 = vpop.f32.mrf.mxu0  ;;  %v829_v16 = vpack.c.bf16 %v808_v14, %v807_v13  ;;  %v2172_v13 = vld [vmem:[%s2335_s4] ss:$0 sm:$0xff] }
 0x199   : > { %v1503_v17 = vadd.f32 %v1502_v15, %v1501_v11  ;;  %v777_v19 = vmul.f32 0.2, %v685_v12  ;;  %vm745_vm6 = vcmp.gt.f32.partialorder %v685_v12, 0.0 }
 0x19a   : > { %v1504_v18 = vpop.f32.mrf.mxu0  ;;  %1606 = vmatprep.mubr.bf16.mxu1 %v829_v16 }
 0x19b   : > { %v688_v20 = vadd.f32 %v1503_v17, %v2135_v58  ;;  %v809_v26 = vsel %vm745_vm6, %v685_v12, %v777_v19 }
 0x19c   : > { %v1505_v21 = vpop.f32.mrf.mxu0 }
 0x19d   : > { %vm746_vm7 = vcmp.gt.f32.partialorder %v688_v20, 0.0  ;;  %v778_v22 = vmul.f32 0.2, %v688_v20  ;;  %v1506_v23 = vadd.f32 %v1505_v21, %v1504_v18 }
 0x19e   : > { %v1507_v24 = vpop.f32.mrf.mxu0 }
 0x19f   : > { %v693_v25 = vadd.f32 %v1506_v23, %v2135_v58  ;;  %v810_v27 = vsel %vm746_vm7, %v688_v20, %v778_v22 }
 0x1a0   : > { %v1508_v28 = vpop.f32.mrf.mxu0  ;;  %v830_v29 = vpack.c.bf16 %v810_v27, %v809_v26 }
 0x1a1   : > { %v1509_v30 = vadd.f32 %v1508_v28, %v1507_v24  ;;  %v779_v32 = vmul.f32 0.2, %v693_v25  ;;  %vm747_vm8 = vcmp.gt.f32.partialorder %v693_v25, 0.0 }
 0x1a2   : > { %v1510_v31 = vpop.f32.mrf.mxu0  ;;  %1607 = vmatmul.mubr.bf16.gmra.mxu1 %v830_v29 }
 0x1a3   : > { %v696_v33 = vadd.f32 %v1509_v30, %v2135_v58  ;;  %v811_v39 = vsel %vm747_vm8, %v693_v25, %v779_v32 }
 0x1a4   : > { %v1511_v34 = vpop.f32.mrf.mxu0 }
 0x1a5   : > { %vm748_vm9 = vcmp.gt.f32.partialorder %v696_v33, 0.0  ;;  %v780_v35 = vmul.f32 0.2, %v696_v33  ;;  %v1512_v36 = vadd.f32 %v1511_v34, %v1510_v31 }
 0x1a6   : > { %v1513_v37 = vpop.f32.mrf.mxu0 }
 0x1a7   : > { %v701_v38 = vadd.f32 %v1512_v36, %v2135_v58  ;;  %v812_v40 = vsel %vm748_vm9, %v696_v33, %v780_v35 }
 0x1a8   : > { %v1514_v41 = vpop.f32.mrf.mxu0  ;;  %v831_v42 = vpack.c.bf16 %v812_v40, %v811_v39 }
 0x1a9   : > { %v1515_v43 = vadd.f32 %v1514_v41, %v1513_v37  ;;  %v781_v45 = vmul.f32 0.2, %v701_v38  ;;  %vm749_vm10 = vcmp.gt.f32.partialorder %v701_v38, 0.0 }
 0x1aa   : > { %v1516_v44 = vpop.f32.mrf.mxu0  ;;  %1610 = vmatprep.mubr.bf16.mxu1 %v831_v42 }
 0x1ab   : > { %v704_v46 = vadd.f32 %v1515_v43, %v2135_v58  ;;  %v813_v52 = vsel %vm749_vm10, %v701_v38, %v781_v45 }
 0x1ac   : > { %v1517_v47 = vpop.f32.mrf.mxu0 }
 0x1ad   : > { %vm750_vm11 = vcmp.gt.f32.partialorder %v704_v46, 0.0  ;;  %v782_v48 = vmul.f32 0.2, %v704_v46  ;;  %v1518_v49 = vadd.f32 %v1517_v47, %v1516_v44 }
 0x1ae   : > { %v1519_v50 = vpop.f32.mrf.mxu0 }
 0x1af   : > { %v709_v51 = vadd.f32 %v1518_v49, %v2135_v58  ;;  %v814_v53 = vsel %vm750_vm11, %v704_v46, %v782_v48 }
 0x1b0   : > { %v1520_v54 = vpop.f32.mrf.mxu0  ;;  %v832_v55 = vpack.c.bf16 %v814_v53, %v813_v52 }
 0x1b1   : > { %v1521_v56 = vadd.f32 %v1520_v54, %v1519_v50  ;;  %v783_v59 = vmul.f32 0.2, %v709_v51  ;;  %vm751_vm12 = vcmp.gt.f32.partialorder %v709_v51, 0.0  ;;  %v2217_v54 = vld [vmem:[%s2336_s5] sm:$0x1] }
 0x1b2   : > { %v1522_v57 = vpop.f32.mrf.mxu0  ;;  %1611 = vmatmul.mubr.bf16.gmra.mxu1 %v832_v55 }
 0x1b3   : > { %v712_v60 = vadd.f32 %v1521_v56, %v2135_v58  ;;  %v815_v2 = vsel %vm751_vm12, %v709_v51, %v783_v59  ;;  %v1881_v59 = vmov 0  }
 0x1b4   : > { %v1523_v61 = vpop.f32.mrf.mxu0  ;;  %1691 = vset.pattern.permute.xlu0 %v1881_v59 }
 0x1b5   : > { %vm752_vm13 = vcmp.gt.f32.partialorder %v712_v60, 0.0  ;;  %v784_v62 = vmul.f32 0.2, %v712_v60  ;;  %v1524_v63 = vadd.f32 %v1523_v61, %v1522_v57  ;;  %v1180_v57 = vld [vmem:[#allocation2] sm:$0x1] }
 0x1b6   : > { %v1525_v0 = vpop.f32.mrf.mxu0  ;;  %1183 = vperm.xlu0 %1691, %v1180_v57  }
 0x1b7   : > { %v717_v1 = vadd.f32 %v1524_v63, %v2135_v58  ;;  %v816_v3 = vsel %vm752_vm13, %v712_v60, %v784_v62 }
 0x1b8   : > { %v1526_v4 = vpop.f32.mrf.mxu0  ;;  %v833_v5 = vpack.c.bf16 %v816_v3, %v815_v2 }
 0x1b9   : > { %v1527_v6 = vadd.f32 %v1526_v4, %v1525_v0  ;;  %v785_v7 = vmul.f32 0.2, %v717_v1  ;;  %vm753_vm14 = vcmp.gt.f32.partialorder %v717_v1, 0.0 }
 0x1ba   : > { %1614 = vmatprep.mubr.bf16.mxu1 %v833_v5 }
 0x1bb   : > { %v720_v8 = vadd.f32 %v1527_v6, %v2135_v58  ;;  %v817_v10 = vsel %vm753_vm14, %v717_v1, %v785_v7 }
 0x1bd   : > { %vm754_vm15 = vcmp.gt.f32.partialorder %v720_v8, 0.0  ;;  %v786_v9 = vmul.f32 0.2, %v720_v8 }
 0x1bf   : > { %v818_v11 = vsel %vm754_vm15, %v720_v8, %v786_v9 }
 0x1c0   : > { %v834_v12 = vpack.c.bf16 %v818_v11, %v817_v10 }
 0x1c2   : > { %1615 = vmatmul.mubr.bf16.gmra.mxu1 %v834_v12 }
 0x1c3   : > { %1568 = vmatprep.mubr.bf16.mxu1 %v2217_v54 }
 0x212   : > { %v1588_v14 = vpop.f32.mrf.mxu1 }
 0x213   : > { %v949_v15 = vadd.f32 %v1588_v14, %v2172_v13 }
 0x214   : > { %v940_v16 = vpop.f32.mrf.mxu1 }
 0x215   : > { %v941_v17 = vadd.f32 %v2172_v13, %v940_v16  ;;  %v1101_v58 = vmul.f32 0.2, %v949_v15  ;;  %vm1069_vm0 = vcmp.gt.f32.partialorder %v949_v15, 0.0 }
 0x216   : > { %v1589_v18 = vpop.f32.mrf.mxu1 }
 0x217   : > { %v952_v19 = vadd.f32 %v1589_v18, %v2172_v13  ;;  %v1099_v21 = vmul.f32 0.2, %v941_v17  ;;  %vm1067_vm2 = vcmp.gt.f32.partialorder %v941_v17, 0.0  ;;  %v2178_v24 = vsel %vm1069_vm0, %v949_v15, %v1101_v58 }
 0x218   : > { %v943_v20 = vpop.f32.mrf.mxu1 }
 0x219   : > { %vm1070_vm1 = vcmp.gt.f32.partialorder %v952_v19, 0.0  ;;  %v1102_v22 = vmul.f32 0.2, %v952_v19  ;;  %v944_v23 = vadd.f32 %v2172_v13, %v943_v20  ;;  %v2184_v28 = vsel %vm1067_vm2, %v941_v17, %v1099_v21 }
 0x21b   : > { %v2180_v25 = vsel %vm1070_vm1, %v952_v19, %v1102_v22  ;;  %vm1068_vm3 = vcmp.gt.f32.partialorder %v944_v23, 0.0  ;;  %v1100_v26 = vmul.f32 0.2, %v944_v23 }
 0x21c   : > { %v1165_v27 = vpack.c.bf16 %v2180_v25, %v2178_v24 }
 0x21d   : > { %v2186_v29 = vsel %vm1068_vm3, %v944_v23, %v1100_v26 }
 0x21e   : > { %v1164_v30 = vpack.c.bf16 %v2186_v29, %v2184_v28 }
 0x222   : > { %v1592_v31 = vpop.f32.mrf.mxu1 }
 0x223   : > { %v965_v32 = vadd.f32 %v1592_v31, %v2172_v13 }
 0x224   : > { %v956_v33 = vpop.f32.mrf.mxu1 }
 0x225   : > { %v957_v34 = vadd.f32 %v2172_v13, %v956_v33  ;;  %v1105_v36 = vmul.f32 0.2, %v965_v32  ;;  %vm1073_vm4 = vcmp.gt.f32.partialorder %v965_v32, 0.0 }
 0x226   : > { %v1593_v35 = vpop.f32.mrf.mxu1 }
 0x227   : > { %v968_v37 = vadd.f32 %v1593_v35, %v2172_v13  ;;  %v1103_v39 = vmul.f32 0.2, %v957_v34  ;;  %vm1071_vm6 = vcmp.gt.f32.partialorder %v957_v34, 0.0  ;;  %v2194_v42 = vsel %vm1073_vm4, %v965_v32, %v1105_v36 }
 0x228   : > { %v959_v38 = vpop.f32.mrf.mxu1 }
 0x229   : > { %vm1074_vm5 = vcmp.gt.f32.partialorder %v968_v37, 0.0  ;;  %v1106_v40 = vmul.f32 0.2, %v968_v37  ;;  %v960_v41 = vadd.f32 %v2172_v13, %v959_v38  ;;  %v2200_v46 = vsel %vm1071_vm6, %v957_v34, %v1103_v39 }
 0x22b   : > { %v2196_v43 = vsel %vm1074_vm5, %v968_v37, %v1106_v40  ;;  %vm1072_vm7 = vcmp.gt.f32.partialorder %v960_v41, 0.0  ;;  %v1104_v44 = vmul.f32 0.2, %v960_v41 }
 0x22c   : > { %v1167_v45 = vpack.c.bf16 %v2196_v43, %v2194_v42 }
 0x22d   : > { %v2202_v47 = vsel %vm1072_vm7, %v960_v41, %v1104_v44 }
 0x22e   : > { %v1166_v48 = vpack.c.bf16 %v2202_v47, %v2200_v46 }
 0x232   : > { %v2206_v49 = vpop.f32.mrf.mxu1 }
 0x234   : > { %v2208_v50 = vpop.f32.mrf.mxu1 }
 0x236   : > { %v2210_v51 = vpop.f32.mrf.mxu1 }
 0x238   : > { %v2212_v52 = vpop.f32.mrf.mxu1 }
 0x242   : > { %v1600_v53 = vpop.f32.mrf.mxu1 }
 0x243   : > { %v997_v32 = vadd.f32 %v1600_v53, %v2172_v13 }
 0x244   : > { %v2219_v55 = vpop.f32.mrf.mxu1 }
 0x245   : > { %vm1081_vm13 = vcmp.gt.f32.partialorder %v997_v32, 0.0  ;;  %v1113_v39 = vmul.f32 0.2, %v997_v32 }
 0x246   : > { %v1601_v56 = vpop.f32.mrf.mxu1 }
 0x247   : > { %v1000_v23 = vadd.f32 %v1601_v56, %v2172_v13 }
 0x248   : > { %v991_v60 = vpop.f32.mrf.mxu1 }
 0x249   : > { %v1114_v35 = vmul.f32 0.2, %v1000_v23  ;;  %vm1082_vm12 = vcmp.gt.f32.partialorder %v1000_v23, 0.0  ;;  %v992_v53 = vadd.f32 %v2172_v13, %v991_v60 }
 0x24b   : > { %v1146_v57 = vsel %vm1082_vm12, %v1000_v23, %v1114_v35  ;;  %vm1080_vm2 = vcmp.gt.f32.partialorder %v992_v53, 0.0 }
 0x252   : > { %v1604_v61 = vpop.f32.mrf.mxu1 }
 0x253   : > { %v1013_v62 = vadd.f32 %v1604_v61, %v2172_v13 }
 0x254   : > { %v1004_v63 = vpop.f32.mrf.mxu1 }
 0x255   : > { %v1005_v0 = vadd.f32 %v2172_v13, %v1004_v63  ;;  %v1117_v2 = vmul.f32 0.2, %v1013_v62  ;;  %vm1085_vm8 = vcmp.gt.f32.partialorder %v1013_v62, 0.0 }
 0x256   : > { %v1605_v1 = vpop.f32.mrf.mxu1 }
 0x257   : > { %v1016_v3 = vadd.f32 %v1605_v1, %v2172_v13  ;;  %v1115_v5 = vmul.f32 0.2, %v1005_v0  ;;  %vm1083_vm10 = vcmp.gt.f32.partialorder %v1005_v0, 0.0  ;;  %v2226_v9 = vsel %vm1085_vm8, %v1013_v62, %v1117_v2 }
 0x258   : > { %v1007_v4 = vpop.f32.mrf.mxu1  ;;  %v989_v1 = vadd.f32 %v2172_v13, %v2219_v55  ;;  %v984_v55 = vadd.f32 %v2210_v51, %v2172_v13 }
 0x259   : > { %vm1086_vm9 = vcmp.gt.f32.partialorder %v1016_v3, 0.0  ;;  %v1118_v6 = vmul.f32 0.2, %v1016_v3  ;;  %v1008_v7 = vadd.f32 %v2172_v13, %v1007_v4  ;;  %v2232_v12 = vsel %vm1083_vm10, %v1005_v0, %v1115_v5 }
 0x25a   : > { %v1145_v0 = vsel %vm1081_vm13, %v997_v32, %v1113_v39  ;;  %vm1079_vm4 = vcmp.gt.f32.partialorder %v989_v1, 0.0  ;;  %v981_v32 = vadd.f32 %v2206_v49, %v2172_v13  ;;  %vm1078_vm6 = vcmp.gt.f32.partialorder %v984_v55, 0.0 }
 0x25b   : > { %vm1084_vm11 = vcmp.gt.f32.partialorder %v1008_v7, 0.0  ;;  %v1116_v8 = vmul.f32 0.2, %v1008_v7  ;;  %v2228_v10 = vsel %vm1086_vm9, %v1016_v3, %v1118_v6  ;;  %v1171_v3 = vpack.c.bf16 %v1146_v57, %v1145_v0 }
 0x25c   : > { %v1173_v11 = vpack.c.bf16 %v2228_v10, %v2226_v9  ;;  %vm1077_vm8 = vcmp.gt.f32.partialorder %v981_v32, 0.0 }
 0x25d   : > { %v2234_v14 = vsel %vm1084_vm11, %v1008_v7, %v1116_v8  ;;  %v1112_v7 = vmul.f32 0.2, %v992_v53 }
 0x25e   : > { %v1172_v15 = vpack.c.bf16 %v2234_v14, %v2232_v12 }
 0x262   : > { %v2238_v16 = vpop.f32.mrf.mxu1 }
 0x264   : > { %v2240_v17 = vpop.f32.mrf.mxu1 }
 0x266   : > { %v2242_v18 = vpop.f32.mrf.mxu1 }
 0x267   : > { %v1032_v49 = vadd.f32 %v2242_v18, %v2172_v13 }
 0x268   : > { %v2244_v58 = vpop.f32.mrf.mxu1 }
 0x269   : > { %vm1090_vm11 = vcmp.gt.f32.partialorder %v1032_v49, 0.0 }
 0x272   : > { %v1612_v19 = vpop.f32.mrf.mxu1 }
 0x273   : > { %v1045_v4 = vadd.f32 %v1612_v19, %v2172_v13 }
 0x274   : > { %v1036_v20 = vpop.f32.mrf.mxu1 }
 0x275   : > { %v1125_v23 = vmul.f32 0.2, %v1045_v4  ;;  %vm1093_vm5 = vcmp.gt.f32.partialorder %v1045_v4, 0.0  ;;  %v1037_v35 = vadd.f32 %v2172_v13, %v1036_v20 }
 0x276   : > { %v1613_v21 = vpop.f32.mrf.mxu1 }
 0x277   : > { %v1048_v59 = vadd.f32 %v1613_v21, %v2172_v13  ;;  %v1111_v21 = vmul.f32 0.2, %v989_v1  ;;  %v1123_v51 = vmul.f32 0.2, %v1037_v35  ;;  %vm1091_vm9 = vcmp.gt.f32.partialorder %v1037_v35, 0.0 }
 0x278   : > { %v1039_v22 = vpop.f32.mrf.mxu1 }
 0x279   : > { %v1126_v8 = vmul.f32 0.2, %v1048_v59  ;;  %vm1094_vm3 = vcmp.gt.f32.partialorder %v1048_v59, 0.0  ;;  %v1040_v19 = vadd.f32 %v2172_v13, %v1039_v22 }
 0x27b   : > { %v1124_v39 = vmul.f32 0.2, %v1040_v19  ;;  %vm1092_vm7 = vcmp.gt.f32.partialorder %v1040_v19, 0.0 }
 0x27d   : > { %v1156_v20 = vsel %vm1092_vm7, %v1040_v19, %v1124_v39 }
 0x282   : > { %v1616_v26 = vpop.f32.mrf.mxu1 }
 0x283   : > { %v1061_v31 = vadd.f32 %v1616_v26, %v2172_v13  ;;  %v1144_v26 = vsel %vm1080_vm2, %v992_v53, %v1112_v7  ;;  %v1029_v53 = vadd.f32 %v2238_v16, %v2172_v13  ;;  %v1021_v16 = vadd.f32 %v2172_v13, %v2240_v17 }
 0x284   : > { %v1052_v33 = vpop.f32.mrf.mxu1 }
 0x285   : > { %v1053_v34 = vadd.f32 %v2172_v13, %v1052_v33  ;;  %v1129_v37 = vmul.f32 0.2, %v1061_v31  ;;  %vm1097_vm14 = vcmp.gt.f32.partialorder %v1061_v31, 0.0  ;;  %v1143_v33 = vsel %vm1079_vm4, %v989_v1, %v1111_v21 }
 0x286   : > { %v1617_v36 = vpop.f32.mrf.mxu1  ;;  %v1121_v18 = vmul.f32 0.2, %v1029_v53  ;;  %vm1089_vm13 = vcmp.gt.f32.partialorder %v1029_v53, 0.0  ;;  %v1119_v7 = vmul.f32 0.2, %v1021_v16 }
 0x287   : > { %v1064_v38 = vadd.f32 %v1617_v36, %v2172_v13  ;;  %v1127_v41 = vmul.f32 0.2, %v1053_v34  ;;  %vm1095_vm0 = vcmp.gt.f32.partialorder %v1053_v34, 0.0  ;;  %v1161_v62 = vsel %vm1097_vm14, %v1061_v31, %v1129_v37 }
 0x288   : > { %v1055_v40 = vpop.f32.mrf.mxu1  ;;  %v1158_v31 = vsel %vm1094_vm3, %v1048_v59, %v1126_v8  ;;  %v1157_v36 = vsel %vm1093_vm5, %v1045_v4, %v1125_v23  ;;  %v1110_v37 = vmul.f32 0.2, %v984_v55  ;;  %v1155_v59 = vsel %vm1091_vm9, %v1037_v35, %v1123_v51 }
 0x289   : > { %vm1098_vm15 = vcmp.gt.f32.partialorder %v1064_v38, 0.0  ;;  %v1130_v44 = vmul.f32 0.2, %v1064_v38  ;;  %v1056_v56 = vadd.f32 %v2172_v13, %v1055_v40  ;;  %v1159_v5 = vsel %vm1095_vm0, %v1053_v34, %v1127_v41 }
 0x28a   : > { %v1170_v34 = vpack.c.bf16 %v1144_v26, %v1143_v33  ;;  %v1109_v40 = vmul.f32 0.2, %v981_v32  ;;  %v1142_v22 = vsel %vm1078_vm6, %v984_v55, %v1110_v37  ;;  %v976_v41 = vadd.f32 %v2172_v13, %v2212_v52 }
 0x28b   : > { %vm1096_vm1 = vcmp.gt.f32.partialorder %v1056_v56, 0.0  ;;  %v1128_v61 = vmul.f32 0.2, %v1056_v56  ;;  %v1162_v63 = vsel %vm1098_vm15, %v1064_v38, %v1130_v44  ;;  %v1177_v38 = vpack.c.bf16 %v1158_v31, %v1157_v36 }
 0x28c   : > { %v1179_v2 = vpack.c.bf16 %v1162_v63, %v1161_v62  ;;  %v1141_v44 = vsel %vm1077_vm8, %v981_v32, %v1109_v40  ;;  %v1176_v62 = vpack.c.bf16 %v1156_v20, %v1155_v59  ;;  %vm1076_vm10 = vcmp.gt.f32.partialorder %v976_v41, 0.0 }
 0x28d   : > { %v1160_v6 = vsel %vm1096_vm1, %v1056_v56, %v1128_v61  ;;  %v973_v56 = vadd.f32 %v2172_v13, %v2208_v50  ;;  %v1169_v57 = vpack.c.bf16 %v1142_v22, %v1141_v44  ;;  %v1108_v61 = vmul.f32 0.2, %v976_v41 }
 0x28e   : > { %1552 = vmatprep.subr.bf16.mxu1 %v1179_v2  ;;  %v1178_v60 = vpack.c.bf16 %v1160_v6, %v1159_v5  ;;  %v1122_v63 = vmul.f32 0.2, %v1032_v49  ;;  %v1024_v50 = vadd.f32 %v2172_v13, %v2244_v58  ;;  %v1153_v4 = vsel %vm1089_vm13, %v1029_v53, %v1121_v18 }
 0x28f   : > { %1553 = vmatpush3.bf16.xpose.msra.mxu1 %v1171_v3  ;;  %v1107_v52 = vmul.f32 0.2, %v973_v56  ;;  %vm1075_vm12 = vcmp.gt.f32.partialorder %v973_v56, 0.0  ;;  %v1140_v0 = vsel %vm1076_vm10, %v976_v41, %v1108_v61  ;;  %vm1087_vm15 = vcmp.gt.f32.partialorder %v1021_v16, 0.0 }
 0x290   : > { %1554 = vmatprep.subr.bf16.mxu1 %v1178_v60  ;;  %v1154_v1 = vsel %vm1090_vm11, %v1032_v49, %v1122_v63  ;;  %v1120_v6 = vmul.f32 0.2, %v1024_v50  ;;  %vm1088_vm14 = vcmp.gt.f32.partialorder %v1024_v50, 0.0  ;;  %v1151_v8 = vsel %vm1087_vm15, %v1021_v16, %v1119_v7 }
 0x291   : > { %v1139_v2 = vsel %vm1075_vm12, %v973_v56, %v1107_v52  ;;  %v1175_v5 = vpack.c.bf16 %v1154_v1, %v1153_v4  ;;  %v1186_v13 = vlaneseq }
 0x292   : > { %v1168_v3 = vpack.c.bf16 %v1140_v0, %v1139_v2  ;;  %v1152_v60 = vsel %vm1088_vm14, %v1024_v50, %v1120_v6 }
 0x293   : > { %v1174_v21 = vpack.c.bf16 %v1152_v60, %v1151_v8  ;;  %v1187_v42 = vshrl.u32 %v1186_v13, 7  ;;  %vm1261_vm0 = vcmp.lt.s32.totalorder %v1186_v13, 256 }
 0x295   : > { %v1188_v43 = vsub.s32 0, %v1187_v42 }
 0x297   : > { %1555 = vmatpush3.bf16.xpose.msra.mxu1 %v1170_v34 }
 0x298   : > { %1556 = vmatprep.subr.bf16.mxu1 %v1177_v38 }
 0x29f   : > { %1557 = vmatpush3.bf16.xpose.msra.mxu1 %v1169_v57 }
 0x2a0   : > { %1558 = vmatprep.subr.bf16.mxu1 %v1176_v62 }
 0x2a7   : > { %1559 = vmatpush3.bf16.xpose.msra.mxu1 %v1168_v3 }
 0x2a8   : > { %1560 = vmatprep.subr.bf16.mxu1 %v1175_v5 }
 0x2af   : > { %1561 = vmatpush3.bf16.xpose.msra.mxu1 %v1167_v45  ;;  %v1184_v45 = vpop.permute.xlu0 %1183 }
 0x2b0   : > { %1562 = vmatprep.subr.bf16.mxu1 %v1174_v21  ;;  %v1189_v46 = vrot.slane %v1184_v45, %v1188_v43 }
 0x2b7   : > { %1563 = vmatpush3.bf16.xpose.msra.mxu1 %v1166_v48 }
 0x2b8   : > { %1564 = vmatprep.subr.bf16.mxu1 %v1173_v11 }
 0x2bf   : > { %1565 = vmatpush3.bf16.xpose.msra.mxu1 %v1165_v27 }
 0x2c0   : > { %1566 = vmatprep.subr.bf16.mxu1 %v1172_v15  ;;  %v1882_v15 = vmov 1966171168  }
 0x2c1   : > { %v1245_v17 = vunpack.c.l.s4 %v1882_v15 }
 0x2c3   : > { %v1246_v58 = vunpack.c.0.s8 %v1245_v17 }
 0x2c5   : > { %v1249_v55 = vsub.s32 %v1246_v58, %v1187_v42 }
 0x2c7   : > { %1567 = vmatpush3.bf16.xpose.msra.mxu1 %v1164_v30 }
 0x2ce   : > { %1569 = vmatmul.mubr.bf16.vlgmr.msra.gmra.mxu1 %v2217_v54 }
 0x38e   : > { %v1224_v47 = vpop.f32.mrf.mxu1 }
 0x38f   : > { %v1225_v48 = vadd.f32 %v1224_v47, %v1189_v46 }
 0x390   : > { %v1226_v9 = vpop.f32.mrf.mxu1 }
 0x391   : > { %v1231_v24 = vsub.f32 0.0, %v1225_v48  ;;  %v1227_v25 = vadd.f32 %v1226_v9, %v1189_v46 }
 0x392   : > { %v1228_v27 = vpop.f32.mrf.mxu1 }
 0x393   : > { %v1233_v10 = vmul.f32 1.442695, %v1231_v24  ;;  %v1232_v11 = vsub.f32 0.0, %v1227_v25 }
 0x394   : > { %v1229_v12 = vpop.f32.mrf.mxu1 }
 0x395   : > { %1716 = vpow2.f32 %v1233_v10  ;;  %v1235_v28 = vmul.f32 1.442695, %v1232_v11 }
 0x397   : > { %1718 = vpow2.f32 %v1235_v28 }
 0x3a2   : > { %v1717_v29 = vpop.eup %1716 }
 0x3a3   : > { %v1237_v30 = vadd.f32 1.0, %v1717_v29 }
 0x3a4   : > { %v1719_v54 = vpop.eup %1718 }
 0x3a5   : > { %v1238_v14 = vadd.f32 1.0, %v1719_v54  ;;  %1720 = vrcp.f32 %v1237_v30 }
 0x3a7   : > { %1722 = vrcp.f32 %v1238_v14 }
 0x3b2   : > { %v1721_v23 = vpop.eup %1720 }
 0x3b4   : > { %v1723_v26 = vpop.eup %1722 }
 0x3b5   : > { %v1243_v19 = vcombine.low %v1721_v23, %v1723_v26 }
 0x3b7   : > { %v1250_v31 = vrot.slane %v1243_v19, %v1249_v55 }
 0x3b9   : > { %v1257_v32 = vrot.slane %v1250_v31, %v1249_v55 }
 0x3bb   : > { %1263 = vst.msk [vmem:[%s328_s25] sm:$0x3] %vm1261_vm0, %v1257_v32 }
 0x3bc   : > { %1817 = shalt.err (!%p1814_p9)
}
 0x3bd   : > { %s1818_s20 = scalar_lea.hbm %s1277_s16, 32  ;;  %s1822_s22 = scalar_lea.hbm %s2338_s7, 64 }
 0x3be   : > { %p1819_p13 = scmp.ne.s32.totalorder %s1277_s16, %s1818_s20  ;;  %p1823_p4 = scmp.lt.s32.totalorder %s1277_s16, %s2338_s7 }
 0x3bf   : > { %p1824_p8 = scmp.lt.s32.totalorder %s1822_s22, %s1818_s20 }
 0x3c0   : > { %p1820_p5 = pnand %p1819_p13, %p2354_p10 }
 0x3c1   : > { %p1825_p3 = por %p1824_p8, %p1823_p4 }
 0x3c2   : > { %p1821_p0 = pneg %p1820_p5 }
 0x3c4   : > { %p1826_p11 = pnand %p1825_p3, %p1821_p0 }
 0x3c6   : > { %1829 = shalt.err (!%p1826_p11)
}
 0x3c7   : > { %1628 = dma.vmem_to_hbm [thread:$0]  (%p2354_p10), %s1280_s23, 32, %s1277_s16, %s1265_s13  }
 0x3c8 PF: > { %s1291_s25 = sand.u32 1, %s1860_s26   ;;  %p2355_p1 = scmp.ne.s32.totalorder %s2344_s9, 0 }
 0x3c9   : > { %p2356_p2 = scmp.ge.s32.totalorder %s1872_s29, 2  ;;  %s1292_s30 = scalar_lea.sflag [#allocation5], %s1291_s25 }
 0x3cb   : > { %p1642_p6 = pnand %p2356_p2, %p2355_p1 }
 0x3cd   : > { %p1643_p12 = pneg %p1642_p6 }
 0x3cf   : > { %1855 = dma.done.wait (%p1643_p12), %s1292_s30, 32  }
 0x3d0   : > { %1857 = vsyncadd (%p1643_p12), %s1292_s30, 4294967264  ;;  %p23_p7 = scmp.ge.s32.totalorder %s1999_s24, 4   ;;  %s2357_s26 = smov %s1864_s27 }
 0x3d1   : > { %s2358_s27 = smov %s1868_s28  ;;  %s2359_s28 = smov %s2015_s12 }
 0x3d2   : > { %s2360_s29 = smov %s1999_s24  ;;  %25 = sbr.rel (!%p23_p7) target bundleno = 9 (0x9), region = 101 }
 0x3d7   :  { %1297 = vsyncpa [#allocation4], 1 }
 0x3d8   :  { %1299 = vsyncpa [#allocation4 + $0x1], 1 }
 0x3d9   :  { %1300 = vsyncpa [#allocation7], 1 }
 0x3da   :  { %1301 = vsyncpa [#allocation5], 1 }
 0x3db   :  { %1303 = vsyncpa [#allocation5 + $0x1], 1 }

</bundles_post_ra>
